<compile_context>
chip_gen: v7x
topology: tpu7x:2x2x1
jax: 0.10.0
libtpu: 0.0.40
codegen_flags: <defaults>
</compile_context>

<pallas_src>
import functools

import jax
import jax.numpy as jnp
from jax.experimental import pallas as pl
from jax.experimental.pallas import tpu as pltpu

_EPS = 1e-5          # BatchNorm1d default eps
_NUM_SLICES = 2      # batch slices -> TensorCores (v7x megacore); fine on 1-TC chips


def _round_up(x, m):
    return ((x + m - 1) // m) * m


def _sublane_multiple(dtype):
    # Second-to-last block-dim granularity: 8 (4-byte), 16 (2-byte), 32 (1-byte).
    return max(8, 32 // jnp.dtype(dtype).itemsize)


def _barlow_partial_kernel(z1_ref, z2_ref, g_ref, m_ref, *,
                           n_total, steps_per_slice, needs_mask):
    """Per-slice partial gram + moment accumulation.

    z1_ref, z2_ref : (TN, D) VMEM input tiles (native dtype; bf16 stays bf16)
    g_ref          : (D, D)  f32 output block, this slice's raw gram
    m_ref          : (4, D)  f32 output block, rows = [sum z1, sum z2, sum z1^2, sum z2^2]
    """
    s = pl.program_id(0)
    t = pl.program_id(1)
    tn = z1_ref.shape[0]

    @pl.when(t == 0)
    def _init():
        g_ref[...] = jnp.zeros_like(g_ref)
        m_ref[...] = jnp.zeros_like(m_ref)

    def _accumulate(z1, z2):
        # Raw gram on the MXU in the native dtype (bf16 x bf16 -> f32 acc when
        # the inputs are bf16; avoids the f32-matmul pass multiplier).
        g_ref[...] += jax.lax.dot_general(
            z1, z2,
            dimension_numbers=(((0,), (0,)), ((), ())),
            preferred_element_type=jnp.float32,
        )
        # Moments in f32 (squaring in bf16 would wreck the batch-variance path).
        z1f = z1.astype(jnp.float32)
        z2f = z2.astype(jnp.float32)
        m_ref[0:1, :] += jnp.sum(z1f, axis=0, keepdims=True)
        m_ref[1:2, :] += jnp.sum(z2f, axis=0, keepdims=True)
        m_ref[2:3, :] += jnp.sum(z1f * z1f, axis=0, keepdims=True)
        m_ref[3:4, :] += jnp.sum(z2f * z2f, axis=0, keepdims=True)

    if not needs_mask:
        _accumulate(z1_ref[...], z2_ref[...])
    else:
        gblk = s * steps_per_slice + t       # intended global tile index
        full_blocks = n_total // tn          # tiles fully inside the batch

        # Only the tiles that actually straddle / pass the end of the batch
        # pay for the iota-compare-select; all earlier tiles stay mask-free.
        @pl.when(gblk < full_blocks)
        def _full():
            _accumulate(z1_ref[...], z2_ref[...])

        @pl.when(gblk >= full_blocks)
        def _partial():
            row = jax.lax.broadcasted_iota(jnp.int32, (tn, 1), 0)
            valid = (gblk * tn + row) < n_total
            _accumulate(jnp.where(valid, z1_ref[...], 0),
                        jnp.where(valid, z2_ref[...], 0))


def barlow_loss(z1, z2, block_n=4096):
    """Returns (on_diag, off_diag), matching Barlow_loss.forward(z1, z2)."""
    assert z1.shape == z2.shape and z1.ndim == 2
    assert z1.dtype == z2.dtype
    n, d = z1.shape

    mult = _sublane_multiple(z1.dtype)
    # Batch tile: multiple of the dtype's sublane packing, capped by block_n.
    # (block_n=8192 is a further win on v7x and still fits the VMEM limit.)
    tn = min(_round_up(block_n, mult), _round_up(n, mult))
    nb = pl.cdiv(n, tn)                    # real tiles in the batch
    num_slices = min(_NUM_SLICES, nb)      # parallel batch slices (megacore)
    spp = pl.cdiv(nb, num_slices)          # tiles per slice
    cover = num_slices * spp               # tiles the grid actually visits
    needs_mask = (cover * tn != n)

    if cover == nb:
        in_map = lambda s, t: (s * spp + t, 0)
    else:
        # Clamp overflow tiles onto the last real tile; the kernel fully masks
        # them, so the (small) redundant DMA contributes nothing.
        in_map = lambda s, t: (jnp.minimum(s * spp + t, nb - 1), 0)

    kernel = functools.partial(
        _barlow_partial_kernel,
        n_total=n, steps_per_slice=spp, needs_mask=needs_mask)

    g_parts, m_parts = pl.pallas_call(
        kernel,
        out_shape=(
            jax.ShapeDtypeStruct((num_slices, d, d), jnp.float32),
            jax.ShapeDtypeStruct((num_slices, 4, d), jnp.float32),
        ),
        grid_spec=pltpu.PrefetchScalarGridSpec(
            num_scalar_prefetch=0,
            grid=(num_slices, spp),
            in_specs=[
                pl.BlockSpec((tn, d), in_map),
                pl.BlockSpec((tn, d), in_map),
            ],
            out_specs=[
                pl.BlockSpec((None, d, d), lambda s, t: (s, 0, 0)),
                pl.BlockSpec((None, 4, d), lambda s, t: (s, 0, 0)),
            ],
        ),
        compiler_params=pltpu.CompilerParams(
            dimension_semantics=("parallel", "arbitrary"),
            vmem_limit_bytes=32 * 1024 * 1024,
        ),
    )(z1, z2)

    # Tiny (D, D) epilogue in plain XLA: reduce per-slice partials and apply
    # the BatchNorm1d(affine=False, training-mode) correction analytically.
    nf = jnp.float32(n)
    g = jnp.sum(g_parts, axis=0)
    mom = jnp.sum(m_parts, axis=0)
    mu1, mu2 = mom[0] / nf, mom[1] / nf
    # TODO(synk): E[x^2]-E[x]^2 can cancel badly for far-from-zero-mean inputs;
    # clamped at 0 here, a shifted two-pass would be more robust if needed.
    var1 = jnp.maximum(mom[2] / nf - mu1 * mu1, 0.0)   # biased batch variance
    var2 = jnp.maximum(mom[3] / nf - mu2 * mu2, 0.0)
    isig1 = jax.lax.rsqrt(var1 + _EPS)
    isig2 = jax.lax.rsqrt(var2 + _EPS)
    c = (g - nf * jnp.outer(mu1, mu2)) * jnp.outer(isig1, isig2) / nf
    diag = jnp.diagonal(c)
    on_diag = jnp.sum((diag - 1.0) ** 2)
    off_diag = jnp.sum(c * c) - jnp.sum(diag * diag)
    return on_diag, off_diag


def _reference(z1, z2):
    # Pure-JAX reference of the PyTorch forward (correctness check only).
    def bn(z):
        m = z.mean(axis=0)
        v = jnp.mean((z - m) ** 2, axis=0)     # biased batch variance
        return (z - m) / jnp.sqrt(v + _EPS)

    c = bn(z1).T @ bn(z2) / z1.shape[0]
    diag = jnp.diag(c)
    on = jnp.sum((diag - 1.0) ** 2)
    off = jnp.sum(c ** 2) - jnp.sum(diag ** 2)
    return on, off


if __name__ == "__main__":
    D = 128  # fixed by BatchNorm1d(128) in the module
    root = jax.random.PRNGKey(0)

    # (batch, block_n, dtype):
    #   * single (partial-free) tile
    #   * multi-tile, partial last tile, split across 2 slices
    #   * odd tile count -> exercises the clamped overflow tile
    #   * bf16 inputs -> native-dtype MXU operands
    cases = [
        (8, 1024, jnp.float32),
        (200, 64, jnp.float32),
        (200, 80, jnp.float32),
        (200, 64, jnp.bfloat16),
    ]
    for n, blk, dt in cases:
        k1, k2 = jax.random.split(jax.random.fold_in(root, n + blk))
        z1 = jax.random.normal(k1, (n, D), dtype=jnp.float32).astype(dt)
        z2 = jax.random.normal(k2, (n, D), dtype=jnp.float32).astype(dt)

        on_diag, off_diag = barlow_loss(z1, z2, block_n=blk)
        jax.block_until_ready((on_diag, off_diag))

        on_ref, off_ref = _reference(z1.astype(jnp.float32),
                                     z2.astype(jnp.float32))
        tol = 2e-3 if dt == jnp.float32 else 5e-2
        assert jnp.allclose(on_diag, on_ref, rtol=tol, atol=tol), (
            n, blk, dt, on_diag, on_ref)
        assert jnp.allclose(off_diag, off_ref, rtol=tol, atol=tol), (
            n, blk, dt, off_diag, off_ref)

    print("KERNEL_OK")
</pallas_src>

<mosaic_0001>
module attributes {stable_mosaic.version = 11 : i64} {
  func.func @_barlow_partial_kernel(%arg0: i32, %arg1: i32, %arg2: memref<8x128xf32, #tpu.memory_space<vmem>>, %arg3: memref<8x128xf32, #tpu.memory_space<vmem>>, %arg4: memref<1x128x128xf32, #tpu.memory_space<vmem>>, %arg5: memref<1x4x128xf32, #tpu.memory_space<vmem>>) attributes {dimension_semantics = [#tpu.dimension_semantics<parallel>, #tpu.dimension_semantics<arbitrary>], iteration_bounds = array<i64: 1, 1>, scalar_prefetch = 0 : i64, scratch_operands = 0 : i64, tpu.core_type = #tpu.core_type<tc>, window_params = [{transform_indices = @transform_0, window_bounds = array<i64: 8, 128>}, {transform_indices = @transform_1, window_bounds = array<i64: 8, 128>}, {transform_indices = @transform_2, window_bounds = array<i64: 1, 128, 128>}, {transform_indices = @transform_3, window_bounds = array<i64: 1, 4, 128>}]} {
    %c0_i32 = arith.constant 0 : i32
    %0 = arith.cmpi eq, %arg1, %c0_i32 : i32
    %1 = arith.extui %0 : i1 to i32
    %c0_i32_0 = arith.constant 0 : i32
    %2 = arith.cmpi ne, %1, %c0_i32_0 : i32
    scf.if %2 {
      %cst_35 = arith.constant 0.000000e+00 : f32
      %46 = vector.broadcast %cst_35 : f32 to vector<128x128xf32>
      %c0_36 = arith.constant 0 : index
      %c0_37 = arith.constant 0 : index
      %c0_38 = arith.constant 0 : index
      %47 = vector.load %arg4[%c0_36, %c0_37, %c0_38] : memref<1x128x128xf32, #tpu.memory_space<vmem>>, vector<1x128x128xf32>
      %48 = vector.shape_cast %47 : vector<1x128x128xf32> to vector<128x128xf32>
      %49 = vector.shape_cast %46 : vector<128x128xf32> to vector<1x128x128xf32>
      tpu.vector_store %arg4[%c0_36, %c0_37, %c0_38], %49 {strides = array<i32>} : memref<1x128x128xf32, #tpu.memory_space<vmem>>, vector<1x128x128xf32>,
      %cst_39 = arith.constant 0.000000e+00 : f32
      %50 = vector.broadcast %cst_39 : f32 to vector<4x128xf32>
      %c0_40 = arith.constant 0 : index
      %c0_41 = arith.constant 0 : index
      %c0_42 = arith.constant 0 : index
      %51 = vector.load %arg5[%c0_40, %c0_41, %c0_42] : memref<1x4x128xf32, #tpu.memory_space<vmem>>, vector<1x4x128xf32>
      %52 = vector.shape_cast %51 : vector<1x4x128xf32> to vector<4x128xf32>
      %53 = vector.shape_cast %50 : vector<4x128xf32> to vector<1x4x128xf32>
      tpu.vector_store %arg5[%c0_40, %c0_41, %c0_42], %53 {strides = array<i32>} : memref<1x4x128xf32, #tpu.memory_space<vmem>>, vector<1x4x128xf32>,
    } else {
    }
    %c0 = arith.constant 0 : index
    %c0_1 = arith.constant 0 : index
    %3 = vector.load %arg2[%c0, %c0_1] : memref<8x128xf32, #tpu.memory_space<vmem>>, vector<8x128xf32>
    %c0_2 = arith.constant 0 : index
    %c0_3 = arith.constant 0 : index
    %4 = vector.load %arg3[%c0_2, %c0_3] : memref<8x128xf32, #tpu.memory_space<vmem>>, vector<8x128xf32>
    %c0_4 = arith.constant 0 : index
    %c0_5 = arith.constant 0 : index
    %c0_6 = arith.constant 0 : index
    %5 = vector.load %arg4[%c0_4, %c0_5, %c0_6] : memref<1x128x128xf32, #tpu.memory_space<vmem>>, vector<1x128x128xf32>
    %6 = vector.shape_cast %5 : vector<1x128x128xf32> to vector<128x128xf32>
    %cst = arith.constant dense<0.000000e+00> : vector<128x128xf32>
    %7 = tpu.matmul %3, %4, %cst {dimension_numbers = #tpu.dot_dimension_numbers<[0], [0], [1], [1], [0, 1, 1, 1], [], []>} : vector<8x128xf32>, vector<8x128xf32>, vector<128x128xf32> -> vector<128x128xf32>
    %8 = arith.addf %6, %7 : vector<128x128xf32>
    %c0_7 = arith.constant 0 : index
    %c0_8 = arith.constant 0 : index
    %c0_9 = arith.constant 0 : index
    %9 = vector.load %arg4[%c0_7, %c0_8, %c0_9] : memref<1x128x128xf32, #tpu.memory_space<vmem>>, vector<1x128x128xf32>
    %10 = vector.shape_cast %9 : vector<1x128x128xf32> to vector<128x128xf32>
    %11 = vector.shape_cast %8 : vector<128x128xf32> to vector<1x128x128xf32>
    tpu.vector_store %arg4[%c0_7, %c0_8, %c0_9], %11 {strides = array<i32>} : memref<1x128x128xf32, #tpu.memory_space<vmem>>, vector<1x128x128xf32>,
    %c0_10 = arith.constant 0 : index
    %c0_11 = arith.constant 0 : index
    %c0_12 = arith.constant 0 : index
    %12 = vector.load %arg5[%c0_10, %c0_11, %c0_12] : memref<1x4x128xf32, #tpu.memory_space<vmem>>, vector<1x1x128xf32>
    %13 = vector.shape_cast %12 : vector<1x1x128xf32> to vector<1x128xf32>
    %cst_13 = arith.constant dense<0.000000e+00> : vector<128xf32>
    %14 = vector.multi_reduction <add>, %3, %cst_13 [0] : vector<8x128xf32> to vector<128xf32>
    %15 = vector.shape_cast %14 : vector<128xf32> to vector<1x128xf32>
    %16 = arith.addf %13, %15 : vector<1x128xf32>
    %c0_14 = arith.constant 0 : index
    %c0_15 = arith.constant 0 : index
    %c0_16 = arith.constant 0 : index
    %17 = vector.load %arg5[%c0_14, %c0_15, %c0_16] : memref<1x4x128xf32, #tpu.memory_space<vmem>>, vector<1x1x128xf32>
    %18 = vector.shape_cast %17 : vector<1x1x128xf32> to vector<1x128xf32>
    %19 = vector.shape_cast %16 : vector<1x128xf32> to vector<1x1x128xf32>
    tpu.vector_store %arg5[%c0_14, %c0_15, %c0_16], %19 {strides = array<i32>} : memref<1x4x128xf32, #tpu.memory_space<vmem>>, vector<1x1x128xf32>,
    %c0_17 = arith.constant 0 : index
    %c1 = arith.constant 1 : index
    %c0_18 = arith.constant 0 : index
    %20 = vector.load %arg5[%c0_17, %c1, %c0_18] : memref<1x4x128xf32, #tpu.memory_space<vmem>>, vector<1x1x128xf32>
    %21 = vector.shape_cast %20 : vector<1x1x128xf32> to vector<1x128xf32>
    %cst_19 = arith.constant dense<0.000000e+00> : vector<128xf32>
    %22 = vector.multi_reduction <add>, %4, %cst_19 [0] : vector<8x128xf32> to vector<128xf32>
    %23 = vector.shape_cast %22 : vector<128xf32> to vector<1x128xf32>
    %24 = arith.addf %21, %23 : vector<1x128xf32>
    %c0_20 = arith.constant 0 : index
    %c1_21 = arith.constant 1 : index
    %c0_22 = arith.constant 0 : index
    %25 = vector.load %arg5[%c0_20, %c1_21, %c0_22] : memref<1x4x128xf32, #tpu.memory_space<vmem>>, vector<1x1x128xf32>
    %26 = vector.shape_cast %25 : vector<1x1x128xf32> to vector<1x128xf32>
    %27 = vector.shape_cast %24 : vector<1x128xf32> to vector<1x1x128xf32>
    tpu.vector_store %arg5[%c0_20, %c1_21, %c0_22], %27 {strides = array<i32>} : memref<1x4x128xf32, #tpu.memory_space<vmem>>, vector<1x1x128xf32>,
    %c0_23 = arith.constant 0 : index
    %c2 = arith.constant 2 : index
    %c0_24 = arith.constant 0 : index
    %28 = vector.load %arg5[%c0_23, %c2, %c0_24] : memref<1x4x128xf32, #tpu.memory_space<vmem>>, vector<1x1x128xf32>
    %29 = vector.shape_cast %28 : vector<1x1x128xf32> to vector<1x128xf32>
    %30 = arith.mulf %3, %3 : vector<8x128xf32>
    %cst_25 = arith.constant dense<0.000000e+00> : vector<128xf32>
    %31 = vector.multi_reduction <add>, %30, %cst_25 [0] : vector<8x128xf32> to vector<128xf32>
    %32 = vector.shape_cast %31 : vector<128xf32> to vector<1x128xf32>
    %33 = arith.addf %29, %32 : vector<1x128xf32>
    %c0_26 = arith.constant 0 : index
    %c2_27 = arith.constant 2 : index
    %c0_28 = arith.constant 0 : index
    %34 = vector.load %arg5[%c0_26, %c2_27, %c0_28] : memref<1x4x128xf32, #tpu.memory_space<vmem>>, vector<1x1x128xf32>
    %35 = vector.shape_cast %34 : vector<1x1x128xf32> to vector<1x128xf32>
    %36 = vector.shape_cast %33 : vector<1x128xf32> to vector<1x1x128xf32>
    tpu.vector_store %arg5[%c0_26, %c2_27, %c0_28], %36 {strides = array<i32>} : memref<1x4x128xf32, #tpu.memory_space<vmem>>, vector<1x1x128xf32>,
    %c0_29 = arith.constant 0 : index
    %c3 = arith.constant 3 : index
    %c0_30 = arith.constant 0 : index
    %37 = vector.load %arg5[%c0_29, %c3, %c0_30] : memref<1x4x128xf32, #tpu.memory_space<vmem>>, vector<1x1x128xf32>
    %38 = vector.shape_cast %37 : vector<1x1x128xf32> to vector<1x128xf32>
    %39 = arith.mulf %4, %4 : vector<8x128xf32>
    %cst_31 = arith.constant dense<0.000000e+00> : vector<128xf32>
    %40 = vector.multi_reduction <add>, %39, %cst_31 [0] : vector<8x128xf32> to vector<128xf32>
    %41 = vector.shape_cast %40 : vector<128xf32> to vector<1x128xf32>
    %42 = arith.addf %38, %41 : vector<1x128xf32>
    %c0_32 = arith.constant 0 : index
    %c3_33 = arith.constant 3 : index
    %c0_34 = arith.constant 0 : index
    %43 = vector.load %arg5[%c0_32, %c3_33, %c0_34] : memref<1x4x128xf32, #tpu.memory_space<vmem>>, vector<1x1x128xf32>
    %44 = vector.shape_cast %43 : vector<1x1x128xf32> to vector<1x128xf32>
    %45 = vector.shape_cast %42 : vector<1x128xf32> to vector<1x1x128xf32>
    tpu.vector_store %arg5[%c0_32, %c3_33, %c0_34], %45 {strides = array<i32>} : memref<1x4x128xf32, #tpu.memory_space<vmem>>, vector<1x1x128xf32>,
    return
  }
  func.func @transform_0(%arg0: i32, %arg1: i32) -> (i32, i32) {
    %c1_i32 = arith.constant 1 : i32
    %0 = arith.muli %arg0, %c1_i32 : i32
    %1 = arith.addi %0, %arg1 : i32
    %c0_i32 = arith.constant 0 : i32
    %c0_i32_0 = arith.constant 0 : i32
    return %1, %c0_i32 : i32, i32
  }
  func.func @transform_1(%arg0: i32, %arg1: i32) -> (i32, i32) {
    %c1_i32 = arith.constant 1 : i32
    %0 = arith.muli %arg0, %c1_i32 : i32
    %1 = arith.addi %0, %arg1 : i32
    %c0_i32 = arith.constant 0 : i32
    %c0_i32_0 = arith.constant 0 : i32
    return %1, %c0_i32 : i32, i32
  }
  func.func @transform_2(%arg0: i32, %arg1: i32) -> (i32, i32, i32) {
    %c0_i32 = arith.constant 0 : i32
    %c0_i32_0 = arith.constant 0 : i32
    %c0_i32_1 = arith.constant 0 : i32
    return %arg0, %c0_i32, %c0_i32_0 : i32, i32, i32
  }
  func.func @transform_3(%arg0: i32, %arg1: i32) -> (i32, i32, i32) {
    %c0_i32 = arith.constant 0 : i32
    %c0_i32_0 = arith.constant 0 : i32
    %c0_i32_1 = arith.constant 0 : i32
    return %arg0, %c0_i32, %c0_i32_0 : i32, i32, i32
  }
}

</mosaic_0001>

<bundles_post_ra>
// kernel: tpu_custom_call.1
= control target key start
LH: loop header
LB: loop body
LE: loop exit
PB: predicated region body
PF: predicated region fallthrough
CT: control target
= control target key end

     0   :  { %9 = vsyncpa [#allocation3], 0  ;;  %s669_s0 = inlined_call_operand.hbm [shape: f32[8,128], index: 0, kind: input, shape index: {}]   ;;  %s670_s1 = inlined_call_operand.hbm [shape: f32[8,128], index: 1, kind: input, shape index: {}]   ;;  %s671_s2 = inlined_call_operand.hbm [shape: f32[1,128,128], index: 2, kind: output, shape index: {0}]   ;;  %s672_s3 = inlined_call_operand.hbm [shape: f32[1,4,128], index: 3, kind: output, shape index: {1}]  }
   0x1   :  { %10 = vsyncpa [#allocation6], 0 }
   0x2   :  { %11 = vsyncpa [#allocation4], 0 }
   0x3   :  { %12 = vsyncpa [#allocation9], 0  ;;  %s578_s12 = smov [#allocation2]   ;;  %s579_s14 = smov [#allocation5]  }
   0x4   :  { %s22_s13 = sshll.u32 %s578_s12, 4  ;;  %s35_s15 = sshll.u32 %s579_s14, 4  ;;  %s23_s13 = int_to_ptr.vmem [resolvable:$true] %s22_s13  ;;  %s36_s15 = int_to_ptr.vmem [resolvable:$true] %s35_s15 }
   0x5   :  { %s482_s18 = scalar_lea.hbm %s669_s0, 128 }
   0x6   :  { %p483_p0 = scmp.ne.s32.totalorder %s669_s0, %s482_s18  ;;  %p486_p1 = scmp.lt.u32.totalorder %s482_s18, %s669_s0 }
   0x8   :  { %p488_p2 = pnand %p486_p1, %p483_p0 }
   0xa   :  { %491 = shalt.err (!%p488_p2)
}
   0xb   :  { %s492_s23 = scalar_lea.vmem %s23_s13, 128  ;;  %p497_p4 = scmp.lt.s32.totalorder %s23_s13, %s23_s13 }
   0xc   :  { %p493_p3 = scmp.ne.s32.totalorder %s23_s13, %s492_s23  ;;  %p498_p5 = scmp.lt.s32.totalorder %s492_s23, %s492_s23 }
   0xe   :  { %p499_p6 = por %p498_p5, %p497_p4 }
  0x10   :  { %p500_p7 = pnand %p499_p6, %p493_p3 }
  0x12   :  { %503 = shalt.err (!%p500_p7)
}
  0x13   :  { %25 = dma.hbm_to_vmem [thread:$0]  %s669_s0, 128, %s23_s13, [#allocation3]  }
  0x14   :  { %s504_s28 = scalar_lea.hbm %s670_s1, 128 }
  0x15   :  { %p505_p8 = scmp.ne.s32.totalorder %s670_s1, %s504_s28  ;;  %p508_p9 = scmp.lt.u32.totalorder %s504_s28, %s670_s1 }
  0x17   :  { %p510_p10 = pnand %p508_p9, %p505_p8 }
  0x19   :  { %513 = shalt.err (!%p510_p10)
}
  0x1a   :  { %s514_s6 = scalar_lea.vmem %s36_s15, 128  ;;  %p519_p12 = scmp.lt.s32.totalorder %s36_s15, %s36_s15 }
  0x1b   :  { %p515_p11 = scmp.ne.s32.totalorder %s36_s15, %s514_s6  ;;  %p520_p13 = scmp.lt.s32.totalorder %s514_s6, %s514_s6 }
  0x1d   :  { %p521_p0 = por %p520_p13, %p519_p12 }
  0x1f   :  { %p522_p1 = pnand %p521_p0, %p515_p11 }
  0x21   :  { %525 = shalt.err (!%p522_p1)
}
  0x22   :  { %38 = dma.hbm_to_vmem [thread:$0]  %s670_s1, 128, %s36_s15, [#allocation6]  }
  0x23   :  { %570 = dma.done.wait [#allocation3], 128  }
  0x24   :  { %571 = vsyncadd [#allocation3], 4294967168 }
  0x25   :  { %572 = dma.done.wait [#allocation6], 128  }
  0x26   :  { %573 = vsyncadd [#allocation6], 4294967168  ;;  %v68_v0 = vld [vmem:[#allocation2] sm:$0xff]  ;;  %v69_v1 = vld [vmem:[#allocation5] sm:$0xff]  ;;  %v580_v2 = vmov 0.0   ;;  %vm118_vm0 = vcmask 64512  }
  0x27   :  { %86 = vxpose.xlu0.b32.start.end [1/1] (short) %v68_v0, 128  ;;  %447 = vmatprep.subr.mxu0 %v69_v1  ;;  %67 = vst [vmem:[#allocation8] sm:$0xf] %v580_v2  ;;  %v363_v19 = vmul.f32 %v68_v0, %v68_v0  ;;  %v345_v20 = vrot.slane %v68_v0, 4  ;;  %v373_v26 = vmul.f32 %v69_v1, %v69_v1  ;;  %v354_v29 = vrot.slane %v69_v1, 4  ;;  %s581_s1 = smov [#allocation8]  }
  0x28   :  { %473 = vmatprep.subr.mxu1 %v69_v1  ;;  %448 = vmatpush3.msra.mxu0 %v69_v1  ;;  %s400_s8 = sshll.u32 %s581_s1, 4  ;;  %s401_s8 = int_to_ptr.vmem [resolvable:$true] %s400_s8 }
  0x29   :  { %474 = vmatpush3.msra.mxu1 %v69_v1  ;;  %v364_v21 = vrot.slane %v363_v19, 4  ;;  %v346_v22 = vadd.f32 %v345_v20, %v68_v0  ;;  %v374_v30 = vrot.slane %v373_v26, 4  ;;  %v355_v31 = vadd.f32 %v354_v29, %v69_v1  ;;  %s526_s9 = scalar_lea.vmem %s401_s8, 64  ;;  %p531_p3 = scmp.lt.s32.totalorder %s401_s8, %s401_s8 }
  0x2a   :  { %p527_p2 = scmp.ne.s32.totalorder %s401_s8, %s526_s9  ;;  %p532_p4 = scmp.lt.s32.totalorder %s526_s9, %s526_s9 }
  0x2b   :  { %v365_v23 = vadd.f32 %v364_v21, %v363_v19  ;;  %v347_v24 = vrot.slane %v346_v22, 2  ;;  %v375_v32 = vadd.f32 %v374_v30, %v373_v26  ;;  %v356_v35 = vrot.slane %v355_v31, 2 }
  0x2c   :  { %p533_p5 = por %p532_p4, %p531_p3 }
  0x2d   :  { %v366_v25 = vrot.slane %v365_v23, 2  ;;  %v348_v27 = vadd.f32 %v347_v24, %v346_v22  ;;  %v376_v36 = vrot.slane %v375_v32, 2  ;;  %v357_v37 = vadd.f32 %v356_v35, %v355_v31 }
  0x2e   :  { %v344_v45 = vld [vmem:[#allocation8] sm:$0x1]  ;;  %v353_v46 = vld [vmem:[#allocation8 + $0x1] sm:$0x1]  ;;  %v362_v47 = vld [vmem:[#allocation8 + $0x2] sm:$0x1]  ;;  %p534_p6 = pnand %p533_p5, %p527_p2 }
  0x2f   :  { %v367_v28 = vadd.f32 %v366_v25, %v365_v23  ;;  %v349_v33 = vrot.slane %v348_v27, 1  ;;  %v377_v38 = vadd.f32 %v376_v36, %v375_v32  ;;  %v358_v41 = vrot.slane %v357_v37, 1  ;;  %v372_v51 = vld [vmem:[#allocation8 + $0x3] sm:$0x1] }
  0x31   :  { %v368_v34 = vrot.slane %v367_v28, 1  ;;  %v350_v39 = vadd.f32 %v349_v33, %v348_v27  ;;  %v378_v42 = vrot.slane %v377_v38, 1  ;;  %v359_v43 = vadd.f32 %v358_v41, %v357_v37 }
  0x33   :  { %v369_v40 = vadd.f32 %v368_v34, %v367_v28  ;;  %v379_v44 = vadd.f32 %v378_v42, %v377_v38  ;;  %v351_v48 = vadd.f32 %v350_v39, %v344_v45  ;;  %v360_v49 = vadd.f32 %v359_v43, %v353_v46 }
  0x35   :  { %v370_v50 = vadd.f32 %v369_v40, %v362_v47  ;;  %v380_v52 = vadd.f32 %v379_v44, %v372_v51  ;;  %352 = vst [vmem:[#allocation8] sm:$0x1] %v351_v48  ;;  %361 = vst [vmem:[#allocation8 + $0x1] sm:$0x1] %v360_v49 }
  0x37   :  { %371 = vst [vmem:[#allocation8 + $0x2] sm:$0x1] %v370_v50  ;;  %381 = vst [vmem:[#allocation8 + $0x3] sm:$0x1] %v380_v52 }
  0xa7   :  { %v102_v3 = vpop.trf.xlu0 }
  0xa8   :  { %449 = vmatprep.mubr.msk.f32.mxu0 %vm118_vm0, %v102_v3 }
  0xab   :  { %v103_v4 = vpop.trf.xlu0 }
  0xac   :  { %450 = vmatmul.mubr.msk.f32.vlgmr.msra.gmra.mrb[0].mxu0 %vm118_vm0, %v103_v4 }
  0xaf   :  { %v104_v5 = vpop.trf.xlu0 }
  0xb0   :  { %452 = vmatprep.mubr.msk.f32.mxu0 %vm118_vm0, %v104_v5 }
  0xb3   :  { %v105_v6 = vpop.trf.xlu0 }
  0xb4   :  { %453 = vmatmul.mubr.msk.f32.gmra.mrb[2].mxu0 %vm118_vm0, %v105_v6 }
  0xb7   :  { %v106_v7 = vpop.trf.xlu0 }
  0xb8   :  { %455 = vmatprep.mubr.msk.f32.mxu0 %vm118_vm0, %v106_v7 }
  0xbb   :  { %v107_v8 = vpop.trf.xlu0 }
  0xbc   :  { %456 = vmatmul.mubr.msk.f32.gmra.mrb[4].mxu0 %vm118_vm0, %v107_v8 }
  0xbf   :  { %v108_v9 = vpop.trf.xlu0 }
  0xc0   :  { %458 = vmatprep.mubr.msk.f32.mxu0 %vm118_vm0, %v108_v9 }
  0xc3   :  { %v109_v10 = vpop.trf.xlu0 }
  0xc4   :  { %459 = vmatmul.mubr.msk.f32.gmra.mrb[6].mxu0 %vm118_vm0, %v109_v10 }
  0xc7   :  { %v110_v11 = vpop.trf.xlu0 }
  0xc8   :  { %461 = vmatprep.mubr.msk.f32.mxu1 %vm118_vm0, %v110_v11 }
  0xcb   :  { %v111_v12 = vpop.trf.xlu0 }
  0xcc   :  { %462 = vmatmul.mubr.msk.f32.vlgmr.msra.gmra.mrb[0].mxu1 %vm118_vm0, %v111_v12 }
  0xcf   :  { %v112_v13 = vpop.trf.xlu0 }
  0xd0   :  { %464 = vmatprep.mubr.msk.f32.mxu1 %vm118_vm0, %v112_v13 }
  0xd3   :  { %v113_v14 = vpop.trf.xlu0 }
  0xd4   :  { %465 = vmatmul.mubr.msk.f32.gmra.mrb[2].mxu1 %vm118_vm0, %v113_v14 }
  0xd7   :  { %v114_v15 = vpop.trf.xlu0 }
  0xd8   :  { %467 = vmatprep.mubr.msk.f32.mxu1 %vm118_vm0, %v114_v15 }
  0xdb   :  { %v115_v16 = vpop.trf.xlu0 }
  0xdc   :  { %468 = vmatmul.mubr.msk.f32.gmra.mrb[4].mxu1 %vm118_vm0, %v115_v16 }
  0xdf   :  { %v116_v17 = vpop.trf.xlu0 }
  0xe0   :  { %470 = vmatprep.mubr.msk.f32.mxu1 %vm118_vm0, %v116_v17 }
  0xe3   :  { %v117_v18 = vpop.trf.xlu0 }
  0xe4   :  { %471 = vmatmul.mubr.msk.f32.gmra.mrb[6].mxu1 %vm118_vm0, %v117_v18 }
  0xe5   :  { %537 = shalt.err (!%p534_p6)
}
  0xe6   :  { %s538_s12 = scalar_lea.hbm %s672_s3, 64 }
  0xe7   :  { %p539_p7 = scmp.ne.s32.totalorder %s672_s3, %s538_s12  ;;  %p542_p8 = scmp.lt.u32.totalorder %s538_s12, %s672_s3 }
  0xe9   :  { %p544_p9 = pnand %p542_p8, %p539_p7 }
  0xeb   :  { %547 = shalt.err (!%p544_p9)
}
  0xec   :  { %403 = dma.vmem_to_hbm [thread:$0]  %s401_s8, 64, %s672_s3, [#allocation9]  }
  0xed   :  { %s582_s3 = smov [#allocation7]  }
  0xee   :  { %s387_s19 = sshll.u32 %s582_s3, 4  ;;  %s388_s19 = int_to_ptr.vmem [resolvable:$true] %s387_s19 }
  0xef   :  { %s548_s20 = scalar_lea.vmem %s388_s19, 2048  ;;  %p553_p11 = scmp.lt.s32.totalorder %s388_s19, %s388_s19 }
  0xf0   :  { %p549_p10 = scmp.ne.s32.totalorder %s388_s19, %s548_s20  ;;  %p554_p12 = scmp.lt.s32.totalorder %s548_s20, %s548_s20 }
  0xf2   :  { %p555_p13 = por %p554_p12, %p553_p11 }
  0xf4   :  { %p556_p0 = pnand %p555_p13, %p549_p10 }
 0x17f   :  { %v451_v53 = vpop.f32.mrb[0].mxu0 }
 0x180   :  { %v233_v54 = vpop.f32.mrb[1].mxu0  ;;  %329 = vst [vmem:[#allocation7 + $0x8] sm:$0xff] %v451_v53 }
 0x181   :  { %328 = vst [vmem:[#allocation7] sm:$0xff] %v233_v54 }
 0x187   :  { %v454_v55 = vpop.f32.mrb[2].mxu0 }
 0x188   :  { %v243_v56 = vpop.f32.mrb[3].mxu0  ;;  %331 = vst [vmem:[#allocation7 + $0x18] sm:$0xff] %v454_v55 }
 0x189   :  { %330 = vst [vmem:[#allocation7 + $0x10] sm:$0xff] %v243_v56 }
 0x18f   :  { %v457_v57 = vpop.f32.mrb[4].mxu0 }
 0x190   :  { %v253_v58 = vpop.f32.mrb[5].mxu0  ;;  %333 = vst [vmem:[#allocation7 + $0x28] sm:$0xff] %v457_v57 }
 0x191   :  { %332 = vst [vmem:[#allocation7 + $0x20] sm:$0xff] %v253_v58 }
 0x197   :  { %v460_v59 = vpop.f32.mrb[6].mxu0 }
 0x198   :  { %v263_v60 = vpop.f32.mrb[7].mxu0  ;;  %335 = vst [vmem:[#allocation7 + $0x38] sm:$0xff] %v460_v59 }
 0x199   :  { %334 = vst [vmem:[#allocation7 + $0x30] sm:$0xff] %v263_v60 }
 0x19f   :  { %v463_v61 = vpop.f32.mrb[0].mxu1 }
 0x1a0   :  { %v273_v62 = vpop.f32.mrb[1].mxu1  ;;  %337 = vst [vmem:[#allocation7 + $0x48] sm:$0xff] %v463_v61 }
 0x1a1   :  { %336 = vst [vmem:[#allocation7 + $0x40] sm:$0xff] %v273_v62 }
 0x1a7   :  { %v466_v63 = vpop.f32.mrb[2].mxu1 }
 0x1a8   :  { %v283_v0 = vpop.f32.mrb[3].mxu1  ;;  %339 = vst [vmem:[#allocation7 + $0x58] sm:$0xff] %v466_v63 }
 0x1a9   :  { %338 = vst [vmem:[#allocation7 + $0x50] sm:$0xff] %v283_v0 }
 0x1af   :  { %v469_v1 = vpop.f32.mrb[4].mxu1 }
 0x1b0   :  { %v293_v2 = vpop.f32.mrb[5].mxu1  ;;  %341 = vst [vmem:[#allocation7 + $0x68] sm:$0xff] %v469_v1 }
 0x1b1   :  { %340 = vst [vmem:[#allocation7 + $0x60] sm:$0xff] %v293_v2 }
 0x1b7   :  { %v472_v3 = vpop.f32.mrb[6].mxu1 }
 0x1b8   :  { %v303_v4 = vpop.f32.mrb[7].mxu1  ;;  %343 = vst [vmem:[#allocation7 + $0x78] sm:$0xff] %v472_v3 }
 0x1b9   :  { %342 = vst [vmem:[#allocation7 + $0x70] sm:$0xff] %v303_v4 }
 0x1ba   :  { %559 = shalt.err (!%p556_p0)
}
 0x1bb   :  { %s560_s23 = scalar_lea.hbm %s671_s2, 2048 }
 0x1bc   :  { %p561_p1 = scmp.ne.s32.totalorder %s671_s2, %s560_s23  ;;  %p564_p2 = scmp.lt.u32.totalorder %s560_s23, %s671_s2 }
 0x1be   :  { %p566_p3 = pnand %p564_p2, %p561_p1 }
 0x1c0   :  { %569 = shalt.err (!%p566_p3)
}
 0x1c1   :  { %s583_s28 = smov 128   ;;  %s584_s29 = smov 8  }
 0x1c2   :  { %393 = dma.vmem_to_hbm [thread:$0]  %s388_s19, 2048, %s671_s2, [#allocation4], %s583_s28, %s583_s28, %s584_s29  }
 0x1c3   :  { %574 = dma.done.wait [#allocation4], 2048  }
 0x1c4   :  { %575 = vsyncadd [#allocation4], 4294965248 }
 0x1c5   :  { %576 = dma.done.wait [#allocation9], 64  }
 0x1c6   :  { %577 = vsyncadd [#allocation9], 4294967232 }
 0x1c7   :  { %410 = vsyncpa [#allocation3], 1 }
 0x1c8   :  { %411 = vsyncpa [#allocation6], 1 }
 0x1c9   :  { %412 = vsyncpa [#allocation4], 1 }
 0x1ca   :  { %413 = vsyncpa [#allocation9], 1 }

</bundles_post_ra>
